<compile_context>
chip_gen: v7x
topology: tpu7x:2x2x1
jax: 0.10.0
libtpu: 0.0.40
codegen_flags: <defaults>
</compile_context>

<pallas_src>
import functools

import jax
import jax.numpy as jnp
from jax.experimental import pallas as pl
from jax.experimental.pallas import tpu as pltpu


def _activation_kernel(d_ref, o_ref, *, epsilon, half_inv_t):
    # 1/(exp((eps-d)/t)+1) == sigmoid((d-eps)/t) == 0.5*tanh(0.5*(d-eps)/t)+0.5
    # -> single EUP push + a few VPU ops (keeps v7x/bf16 memory-bound).
    x = d_ref[...].astype(jnp.float32)   # f32 compute (v5e has no bf16 VPU/EUP)
    y = (x - epsilon) * half_inv_t
    o_ref[...] = (0.5 * jnp.tanh(y) + 0.5).astype(o_ref.dtype)


def _round_up(x, m):
    return ((x + m - 1) // m) * m


def _pick_lanes(m):
    """Largest multiple-of-128 lane width dividing m (prefer keeping >= 8 rows)."""
    cands = (2048, 1024, 512, 256, 128)
    for c in cands:
        if m % c == 0 and m // c >= 8:
            return c
    for c in cands:
        if m % c == 0:
            return c
    return 128  # unreachable: m is a multiple of 128 by construction


def activation_func(d, epsilon, t):
    """Elementwise 1/(exp((epsilon-d)/t)+1) via a lane-dense streaming Pallas kernel."""
    orig_shape = d.shape
    dtype = d.dtype
    eps = float(epsilon)             # TODO(synk): pass via SMEM scalars if traced under jit
    half_inv_t = 0.5 / float(t)

    flat = d.reshape(-1)             # contiguous reshape: metadata only, no copy
    n = flat.shape[0]
    if n == 0:
        return d

    # Ragged tail (< 128 elems): handled with plain jnp so the streaming body
    # needs no full-tensor pad / output-slice passes.
    rem = n % 128
    if rem:
        main, tail = flat[: n - rem], flat[n - rem:]
        ty = (tail.astype(jnp.float32) - eps) * half_inv_t
        tail_out = (0.5 * jnp.tanh(ty) + 0.5).astype(dtype)
    else:
        main, tail_out = flat, None

    m = main.shape[0]
    if m == 0:
        return tail_out.reshape(orig_shape)

    lanes = _pick_lanes(m)
    rows = m // lanes
    x2d = main.reshape(rows, lanes)

    # ---- block sizing by BYTES of native dtype ------------------------------
    itemsize = dtype.itemsize
    sub = max(8, 32 // itemsize)          # packed sublane tile: 8 (f32), 16 (bf16), 32 (int8)
    row_bytes = lanes * itemsize
    target_block_bytes = 4 << 20          # ~4 MiB/block; in+out x double-buffer ~16 MiB
    min_block_bytes = 512 << 10           # don't shrink below this just to add grid steps

    cap_rows = max(sub, (target_block_bytes // row_bytes) // sub * sub)
    floor_rows = max(sub, (min_block_bytes // row_bytes) // sub * sub)
    steps_rows = _round_up(pl.cdiv(rows, 8), sub)   # >= 8 steps -> both v7x TCs busy
    block_rows = min(cap_rows, max(steps_rows, floor_rows))
    if block_rows >= rows:
        block_rows = rows                 # single full-dim block (small tensors)

    grid = (pl.cdiv(rows, block_rows),)   # partial last block masked by Pallas
    block_bytes = block_rows * row_bytes
    # Cover in+out double buffering (+slack); v5e default scoped VMEM is only 16 MiB.
    vmem_limit = min(max(4 * block_bytes + (4 << 20), 16 << 20), 48 << 20)

    kernel = pl.pallas_call(
        functools.partial(_activation_kernel, epsilon=eps, half_inv_t=half_inv_t),
        out_shape=jax.ShapeDtypeStruct((rows, lanes), dtype),
        grid_spec=pl.GridSpec(
            grid=grid,
            in_specs=[pl.BlockSpec((block_rows, lanes), lambda i: (i, 0))],
            out_specs=pl.BlockSpec((block_rows, lanes), lambda i: (i, 0)),
        ),
        compiler_params=pltpu.CompilerParams(
            dimension_semantics=("parallel",),   # megacore-shardable on v7x
            vmem_limit_bytes=vmem_limit,
        ),
    )

    out_flat = kernel(x2d).reshape(-1)
    if tail_out is not None:
        # TODO(synk): concat costs one extra output pass in the rare ragged case
        # (still cheaper than the old full-tensor pad + slice: two passes).
        out_flat = jnp.concatenate([out_flat, tail_out])
    return out_flat.reshape(orig_shape)


if __name__ == "__main__":
    epsilon = 0.5
    t = 0.1

    key = jax.random.PRNGKey(0)
    # ActivationFunc takes a distance-like tensor `d`; small 4-D example.
    d = jax.random.uniform(key, (2, 4, 16, 16), dtype=jnp.float32)

    probs = activation_func(d, epsilon, t)
    jax.block_until_ready(probs)

    # Pure-JAX reference check.
    ref = 1.0 / (jnp.exp((epsilon - d) / t) + 1.0)
    assert probs.shape == d.shape
    assert probs.dtype == d.dtype
    assert jnp.allclose(probs, ref, atol=1e-5, rtol=1e-5)

    print("KERNEL_OK")
</pallas_src>

<mosaic_0001>
module attributes {stable_mosaic.version = 11 : i64} {
  func.func @_activation_kernel(%arg0: i32, %arg1: memref<8x256xf32, #tpu.memory_space<vmem>>, %arg2: memref<8x256xf32, #tpu.memory_space<vmem>>) attributes {dimension_semantics = [#tpu.dimension_semantics<parallel>], iteration_bounds = array<i64: 1>, scalar_prefetch = 0 : i64, scratch_operands = 0 : i64, tpu.core_type = #tpu.core_type<tc>, window_params = [{transform_indices = @transform_0, window_bounds = array<i64: 8, 256>}, {transform_indices = @transform_1, window_bounds = array<i64: 8, 256>}]} {
    %c0 = arith.constant 0 : index
    %c0_0 = arith.constant 0 : index
    %0 = vector.load %arg1[%c0, %c0_0] : memref<8x256xf32, #tpu.memory_space<vmem>>, vector<8x256xf32>
    %cst = arith.constant 5.000000e-01 : f32
    %1 = vector.broadcast %cst : f32 to vector<8x256xf32>
    %2 = arith.subf %0, %1 : vector<8x256xf32>
    %cst_1 = arith.constant 5.000000e+00 : f32
    %3 = vector.broadcast %cst_1 : f32 to vector<8x256xf32>
    %4 = arith.mulf %2, %3 : vector<8x256xf32>
    %5 = math.tanh %4 : vector<8x256xf32>
    %cst_2 = arith.constant 5.000000e-01 : f32
    %6 = vector.broadcast %cst_2 : f32 to vector<8x256xf32>
    %7 = arith.mulf %6, %5 : vector<8x256xf32>
    %cst_3 = arith.constant 5.000000e-01 : f32
    %8 = vector.broadcast %cst_3 : f32 to vector<8x256xf32>
    %9 = arith.addf %7, %8 : vector<8x256xf32>
    %c0_4 = arith.constant 0 : index
    %c0_5 = arith.constant 0 : index
    %10 = vector.load %arg2[%c0_4, %c0_5] : memref<8x256xf32, #tpu.memory_space<vmem>>, vector<8x256xf32>
    tpu.vector_store %arg2[%c0_4, %c0_5], %9 {strides = array<i32>} : memref<8x256xf32, #tpu.memory_space<vmem>>, vector<8x256xf32>,
    return
  }
  func.func @transform_0(%arg0: i32) -> (i32, i32) {
    %c0_i32 = arith.constant 0 : i32
    %c0_i32_0 = arith.constant 0 : i32
    return %arg0, %c0_i32 : i32, i32
  }
  func.func @transform_1(%arg0: i32) -> (i32, i32) {
    %c0_i32 = arith.constant 0 : i32
    %c0_i32_0 = arith.constant 0 : i32
    return %arg0, %c0_i32 : i32, i32
  }
}

</mosaic_0001>

<bundles_post_ra>
// kernel: tpu_custom_call.1
= control target key start
LH: loop header
LB: loop body
LE: loop exit
PB: predicated region body
PF: predicated region fallthrough
CT: control target
= control target key end

     0   :  { %6 = vsyncpa [#allocation3], 0  ;;  %s142_s0 = inlined_call_operand.hbm [shape: f32[8,256], index: 0, kind: input, shape index: {}]   ;;  %s143_s1 = inlined_call_operand.hbm [shape: f32[8,256], index: 1, kind: output, shape index: {}]  }
   0x1   :  { %7 = vsyncpa [#allocation4], 0  ;;  %s106_s6 = smov [#allocation2]   ;;  %s58_s10 = scalar_lea.hbm %s142_s0, 256 }
   0x2   :  { %s14_s7 = sshll.u32 %s106_s6, 4  ;;  %p59_p0 = scmp.ne.s32.totalorder %s142_s0, %s58_s10  ;;  %s15_s7 = int_to_ptr.vmem [resolvable:$true] %s14_s7 }
   0x3   :  { %p62_p1 = scmp.lt.u32.totalorder %s58_s10, %s142_s0 }
   0x5   :  { %p64_p2 = pnand %p62_p1, %p59_p0 }
   0x7   :  { %67 = shalt.err (!%p64_p2)
}
   0x8   :  { %s68_s15 = scalar_lea.vmem %s15_s7, 256  ;;  %p73_p4 = scmp.lt.s32.totalorder %s15_s7, %s15_s7 }
   0x9   :  { %p69_p3 = scmp.ne.s32.totalorder %s15_s7, %s68_s15  ;;  %p74_p5 = scmp.lt.s32.totalorder %s68_s15, %s68_s15 }
   0xb   :  { %p75_p6 = por %p74_p5, %p73_p4 }
   0xd   :  { %p76_p7 = pnand %p75_p6, %p69_p3 }
   0xf   :  { %79 = shalt.err (!%p76_p7)
}
  0x10   :  { %17 = dma.hbm_to_vmem [thread:$0]  %s142_s0, 256, %s15_s7, [#allocation3]  }
  0x11   :  { %102 = dma.done.wait [#allocation3], 256  }
  0x12   :  { %103 = vsyncadd [#allocation3], 4294967040  ;;  %v21_v0 = vld [vmem:[#allocation2] sm:$0xff]  ;;  %v22_v1 = vld [vmem:[#allocation2 + $0x8] sm:$0xff]  ;;  %s107_s18 = smov [#allocation5]  }
  0x13   :  { %v50_v2 = vadd.f32 -0.5, %v21_v0  ;;  %v51_v3 = vadd.f32 -0.5, %v22_v1  ;;  %s41_s19 = sshll.u32 %s107_s18, 4  ;;  %s42_s19 = int_to_ptr.vmem [resolvable:$true] %s41_s19 }
  0x14   :  { %s80_s0 = scalar_lea.vmem %s42_s19, 256  ;;  %p85_p9 = scmp.lt.s32.totalorder %s42_s19, %s42_s19 }
  0x15   :  { %v25_v4 = vmul.f32 5.0, %v50_v2  ;;  %v26_v5 = vmul.f32 5.0, %v51_v3  ;;  %p81_p8 = scmp.ne.s32.totalorder %s42_s19, %s80_s0  ;;  %p86_p10 = scmp.lt.s32.totalorder %s80_s0, %s80_s0 }
  0x17   :  { %54 = vtanh.f32 %v25_v4  ;;  %p87_p11 = por %p86_p10, %p85_p9 }
  0x18   :  { %56 = vtanh.f32 %v26_v5 }
  0x19   :  { %p88_p12 = pnand %p87_p11, %p81_p8 }
  0x21   :  { %v55_v6 = vpop.eup %54 }
  0x22   :  { %v57_v7 = vpop.eup %56  ;;  %v29_v8 = vmul.f32 0.5, %v55_v6 }
  0x23   :  { %v30_v9 = vmul.f32 0.5, %v57_v7 }
  0x24   :  { %v31_v10 = vadd.f32 0.5, %v29_v8 }
  0x25   :  { %v32_v11 = vadd.f32 0.5, %v30_v9 }
  0x26   :  { %33 = vst [vmem:[#allocation5] sm:$0xff] %v31_v10 }
  0x27   :  { %34 = vst [vmem:[#allocation5 + $0x8] sm:$0xff] %v32_v11 }
  0x28   :  { %91 = shalt.err (!%p88_p12)
}
  0x29   :  { %s92_s22 = scalar_lea.hbm %s143_s1, 256 }
  0x2a   :  { %p93_p13 = scmp.ne.s32.totalorder %s143_s1, %s92_s22  ;;  %p96_p0 = scmp.lt.u32.totalorder %s92_s22, %s143_s1 }
  0x2c   :  { %p98_p1 = pnand %p96_p0, %p93_p13 }
  0x2e   :  { %101 = shalt.err (!%p98_p1)
}
  0x2f   :  { %44 = dma.vmem_to_hbm [thread:$0]  %s42_s19, 256, %s143_s1, [#allocation4]  }
  0x30   :  { %104 = dma.done.wait [#allocation4], 256  }
  0x31   :  { %105 = vsyncadd [#allocation4], 4294967040 }
  0x32   :  { %48 = vsyncpa [#allocation3], 1 }
  0x33   :  { %49 = vsyncpa [#allocation4], 1 }

</bundles_post_ra>
